<compile_context>
chip_gen: v5e
topology: v5e:2x2
jax: 0.10.0
libtpu: 0.0.40
codegen_flags: <defaults>
</compile_context>

<pallas_src>
import functools

import jax
import jax.numpy as jnp
from jax.experimental import pallas as pl
from jax.experimental.pallas import tpu as pltpu


_DOT = functools.partial(jnp.dot, preferred_element_type=jnp.float32,
                         precision=jax.lax.Precision.HIGHEST)


def _enc_conv_kernel(x_ref, s_ref, w_ref, b_ref, o_ref):
    # x_ref: (bt, H, W)       raw single-channel images.
    # s_ref: (3, Ho, H)       row-gather matrices, one per kernel row kh (0/1 entries).
    # w_ref: (3, W, C*Wo)     column/stride/channel-packed weight tables, one per kh.
    # b_ref: (1, C*Wo)        bias in the output lane layout (lane = c*Wo + ow).
    # o_ref: (bt, Ho, C*Wo)   output block, already in the PyTorch transpose+view layout.
    bt = x_ref.shape[0]

    # Constant operands: loaded once per grid step, outside the per-image loop.
    s_top, s_mid, s_bot = s_ref[0], s_ref[1], s_ref[2]
    w_top, w_mid, w_bot = w_ref[0], w_ref[1], w_ref[2]
    bias = b_ref[...]

    for b in range(bt):                      # bt is small (<= 8): fully unrolled
        xb = x_ref[b]                        # (H, W)
        # Row gather via exact 0/1 matmuls: g_*[oh, :] = x[2*oh + kh - 1, :] (0 if OOB).
        g_top = _DOT(s_top, xb)
        g_mid = _DOT(s_mid, xb)
        g_bot = _DOT(s_bot, xb)
        # Column taps + stride-2 selection + channel packing are all inside wmat.
        acc = _DOT(g_mid, w_mid)
        acc = acc + _DOT(g_top, w_top)
        acc = acc + _DOT(g_bot, w_bot)
        o_ref[b] = (acc + bias).astype(o_ref.dtype)


def _round_up(n, m):
    return ((n + m - 1) // m) * m


def _padded_plane_bytes(rows, cols, itemsize=4):
    # VMEM footprint of one (rows, cols) plane after (8, 128) tile padding.
    return _round_up(rows, 8) * _round_up(cols, 128) * itemsize


def _pick_batch_block(batch, in_img_bytes, out_img_bytes, *, cap=8,
                      data_budget=12 << 20):
    """Largest per-step batch block whose double-buffered in+out blocks fit the
    tile-padded budget, preferring >= 2 grid steps so both v7x TensorCores get work
    and single-TC chips (v5e/v6e) get DMA/compute overlap between steps."""
    per_img = 2 * (in_img_bytes + out_img_bytes)     # x2: double buffering
    bt = max(1, min(batch, cap, data_budget // max(per_img, 1)))
    if batch > 1:
        bt = min(bt, (batch + 1) // 2)               # keep at least 2 grid steps
    return int(bt)


def encoder_forward(x, weight, bias, *, interpret=False):
    """x: (B, 1, H, W) NCHW single-channel. weight: (C, 1, 3, 3). bias: (C,).
    Returns (B, Ho, C*Wo) float32 with Ho = ceil(H/2), Wo = ceil(W/2), matching
    Encoder.forward (conv -> transpose(1,2) -> view) exactly."""
    assert x.ndim == 4 and x.shape[1] == 1
    b, _, h, w = x.shape
    c = weight.shape[0]
    assert weight.shape[1:] == (1, 3, 3)
    ho = (h - 1) // 2 + 1
    wo = (w - 1) // 2 + 1
    cw = c * wo

    # Raw input only; reshape of a contiguous NCHW array is free (no extra HBM pass).
    x3 = x.reshape(b, h, w)
    if x3.dtype not in (jnp.float32, jnp.bfloat16):
        x3 = x3.astype(jnp.float32)

    # ---- Batch-independent constant tables (tiny, built once per call) ------------
    # sel[kh, oh, r] = 1 iff r == 2*oh + kh - 1 and 0 <= r < H  (handles row padding).
    rows = 2 * jnp.arange(ho)[None, :] + jnp.arange(3)[:, None] - 1          # (3, Ho)
    sel = (jnp.arange(h)[None, None, :] == rows[:, :, None]).astype(jnp.float32)

    # wmat[kh, i, c*Wo + ow] = sum_kw weight[c,0,kh,kw] * [i == 2*ow + kw - 1]
    # (handles column padding, stride-2 selection and the channel-major lane layout).
    cols = 2 * jnp.arange(wo)[None, :] + jnp.arange(3)[:, None] - 1          # (3, Wo)
    onehot = (jnp.arange(w)[None, :, None] == cols[:, None, :]).astype(jnp.float32)
    wk = weight[:, 0].astype(jnp.float32)                                    # (C, 3, 3)
    wmat = jnp.einsum('qio,chq->hico', onehot, wk).reshape(3, w, cw)         # (3, W, C*Wo)

    b_row = jnp.repeat(bias.astype(jnp.float32), wo)[None, :]                # (1, C*Wo)

    # ---- Block sizing with (8,128)-tile-padded VMEM accounting --------------------
    in_img = _padded_plane_bytes(h, w, x3.dtype.itemsize)
    out_img = _padded_plane_bytes(ho, cw)
    bt = _pick_batch_block(b, in_img, out_img)
    steps = pl.cdiv(b, bt)

    fixed = (3 * _padded_plane_bytes(ho, h)          # sel
             + 3 * _padded_plane_bytes(w, cw)        # wmat
             + _padded_plane_bytes(1, cw))           # bias
    vmem_limit = int(min(max(2 * fixed + 2 * bt * (in_img + out_img) + (2 << 20),
                             8 << 20), 32 << 20))

    out = pl.pallas_call(
        _enc_conv_kernel,
        out_shape=jax.ShapeDtypeStruct((b, ho, cw), jnp.float32),
        grid=(steps,),
        in_specs=[
            pl.BlockSpec((bt, h, w), lambda i: (i, 0, 0)),
            pl.BlockSpec((3, ho, h), lambda i: (0, 0, 0)),
            pl.BlockSpec((3, w, cw), lambda i: (0, 0, 0)),
            pl.BlockSpec((1, cw), lambda i: (0, 0)),
        ],
        out_specs=pl.BlockSpec((bt, ho, cw), lambda i: (i, 0, 0)),
        compiler_params=pltpu.CompilerParams(
            dimension_semantics=("parallel",),
            vmem_limit_bytes=vmem_limit),
        interpret=interpret,
    )(x3, sel, wmat, b_row)
    return out


if __name__ == "__main__":
    key = jax.random.PRNGKey(0)

    def ref_encoder(x, weight, bias):
        y = jax.lax.conv_general_dilated(
            x, weight, window_strides=(2, 2), padding=((1, 1), (1, 1)),
            dimension_numbers=("NCHW", "OIHW", "NCHW"),
            precision=jax.lax.Precision.HIGHEST) + bias.reshape(1, -1, 1, 1)
        bb, cc, hh, ww = y.shape
        return jnp.transpose(y, (0, 2, 1, 3)).reshape(bb, hh, cc * ww)

    cases = [
        dict(B=2, H=16, W=16, C=4),   # Encoder(input_dim=(16, 16), n_filters=4)
        dict(B=3, H=15, W=13, C=8),   # odd spatial dims + non-dividing batch (masked tail)
        dict(B=4, H=12, W=40, C=8),   # C*Wo = 160 > 128 (lane-dense output case)
    ]
    for cfg in cases:
        key, k_x, k_w, k_b = jax.random.split(key, 4)
        B, H, W, C = cfg["B"], cfg["H"], cfg["W"], cfg["C"]

        x = jax.random.normal(k_x, (B, 1, H, W), jnp.float32)
        bound = 1.0 / (9 ** 0.5)      # Conv2d(1, C, 3x3) default init bound
        weight = jax.random.uniform(k_w, (C, 1, 3, 3), jnp.float32, -bound, bound)
        bias = jax.random.uniform(k_b, (C,), jnp.float32, -bound, bound)

        out = jax.block_until_ready(encoder_forward(x, weight, bias))
        ref = ref_encoder(x, weight, bias)

        ho, wo = (H - 1) // 2 + 1, (W - 1) // 2 + 1
        assert out.shape == (B, ho, C * wo), (out.shape, (B, ho, C * wo))
        err = float(jnp.max(jnp.abs(out - ref)))
        assert err < 1e-3, err

    print("KERNEL_OK")
</pallas_src>

<mosaic_0001>
module attributes {stable_mosaic.version = 11 : i64} {
  func.func @_enc_conv_kernel(%arg0: i32, %arg1: memref<1x16x16xf32, #tpu.memory_space<vmem>>, %arg2: memref<3x8x16xf32, #tpu.memory_space<vmem>>, %arg3: memref<3x16x32xf32, #tpu.memory_space<vmem>>, %arg4: memref<1x32xf32, #tpu.memory_space<vmem>>, %arg5: memref<1x8x32xf32, #tpu.memory_space<vmem>>) attributes {dimension_semantics = [#tpu.dimension_semantics<parallel>], iteration_bounds = array<i64: 2>, scalar_prefetch = 0 : i64, scratch_operands = 0 : i64, tpu.core_type = #tpu.core_type<tc>, window_params = [{transform_indices = @transform_0, window_bounds = array<i64: 1, 16, 16>}, {pipeline_mode = #tpu.pipeline_mode<synchronous>, transform_indices = @transform_1, window_bounds = array<i64: 3, 8, 16>}, {pipeline_mode = #tpu.pipeline_mode<synchronous>, transform_indices = @transform_2, window_bounds = array<i64: 3, 16, 32>}, {pipeline_mode = #tpu.pipeline_mode<synchronous>, transform_indices = @transform_3, window_bounds = array<i64: 1, 32>}, {transform_indices = @transform_4, window_bounds = array<i64: 1, 8, 32>}]} {
    %c0 = arith.constant 0 : index
    %c0_0 = arith.constant 0 : index
    %c0_1 = arith.constant 0 : index
    %0 = vector.load %arg2[%c0, %c0_0, %c0_1] : memref<3x8x16xf32, #tpu.memory_space<vmem>>, vector<1x8x16xf32>
    %1 = vector.shape_cast %0 : vector<1x8x16xf32> to vector<8x16xf32>
    %c1 = arith.constant 1 : index
    %c0_2 = arith.constant 0 : index
    %c0_3 = arith.constant 0 : index
    %2 = vector.load %arg2[%c1, %c0_2, %c0_3] : memref<3x8x16xf32, #tpu.memory_space<vmem>>, vector<1x8x16xf32>
    %3 = vector.shape_cast %2 : vector<1x8x16xf32> to vector<8x16xf32>
    %c2 = arith.constant 2 : index
    %c0_4 = arith.constant 0 : index
    %c0_5 = arith.constant 0 : index
    %4 = vector.load %arg2[%c2, %c0_4, %c0_5] : memref<3x8x16xf32, #tpu.memory_space<vmem>>, vector<1x8x16xf32>
    %5 = vector.shape_cast %4 : vector<1x8x16xf32> to vector<8x16xf32>
    %c0_6 = arith.constant 0 : index
    %c0_7 = arith.constant 0 : index
    %c0_8 = arith.constant 0 : index
    %6 = vector.load %arg3[%c0_6, %c0_7, %c0_8] : memref<3x16x32xf32, #tpu.memory_space<vmem>>, vector<1x16x32xf32>
    %7 = vector.shape_cast %6 : vector<1x16x32xf32> to vector<16x32xf32>
    %c1_9 = arith.constant 1 : index
    %c0_10 = arith.constant 0 : index
    %c0_11 = arith.constant 0 : index
    %8 = vector.load %arg3[%c1_9, %c0_10, %c0_11] : memref<3x16x32xf32, #tpu.memory_space<vmem>>, vector<1x16x32xf32>
    %9 = vector.shape_cast %8 : vector<1x16x32xf32> to vector<16x32xf32>
    %c2_12 = arith.constant 2 : index
    %c0_13 = arith.constant 0 : index
    %c0_14 = arith.constant 0 : index
    %10 = vector.load %arg3[%c2_12, %c0_13, %c0_14] : memref<3x16x32xf32, #tpu.memory_space<vmem>>, vector<1x16x32xf32>
    %11 = vector.shape_cast %10 : vector<1x16x32xf32> to vector<16x32xf32>
    %c0_15 = arith.constant 0 : index
    %c0_16 = arith.constant 0 : index
    %12 = vector.load %arg4[%c0_15, %c0_16] : memref<1x32xf32, #tpu.memory_space<vmem>>, vector<1x32xf32>
    %c0_17 = arith.constant 0 : index
    %c0_18 = arith.constant 0 : index
    %c0_19 = arith.constant 0 : index
    %13 = vector.load %arg1[%c0_17, %c0_18, %c0_19] : memref<1x16x16xf32, #tpu.memory_space<vmem>>, vector<1x16x16xf32>
    %14 = vector.shape_cast %13 : vector<1x16x16xf32> to vector<16x16xf32>
    %cst = arith.constant dense<0.000000e+00> : vector<8x16xf32>
    %15 = tpu.matmul %1, %14, %cst {dimension_numbers = #tpu.dot_dimension_numbers<[1], [0], [0], [1], [0, 0, 1, 1], [], []>, precision = #tpu.contract_precision<fp32>} : vector<8x16xf32>, vector<16x16xf32>, vector<8x16xf32> -> vector<8x16xf32>
    %cst_20 = arith.constant dense<0.000000e+00> : vector<8x16xf32>
    %16 = tpu.matmul %3, %14, %cst_20 {dimension_numbers = #tpu.dot_dimension_numbers<[1], [0], [0], [1], [0, 0, 1, 1], [], []>, precision = #tpu.contract_precision<fp32>} : vector<8x16xf32>, vector<16x16xf32>, vector<8x16xf32> -> vector<8x16xf32>
    %cst_21 = arith.constant dense<0.000000e+00> : vector<8x16xf32>
    %17 = tpu.matmul %5, %14, %cst_21 {dimension_numbers = #tpu.dot_dimension_numbers<[1], [0], [0], [1], [0, 0, 1, 1], [], []>, precision = #tpu.contract_precision<fp32>} : vector<8x16xf32>, vector<16x16xf32>, vector<8x16xf32> -> vector<8x16xf32>
    %cst_22 = arith.constant dense<0.000000e+00> : vector<8x32xf32>
    %18 = tpu.matmul %16, %9, %cst_22 {dimension_numbers = #tpu.dot_dimension_numbers<[1], [0], [0], [1], [0, 0, 1, 1], [], []>, precision = #tpu.contract_precision<fp32>} : vector<8x16xf32>, vector<16x32xf32>, vector<8x32xf32> -> vector<8x32xf32>
    %cst_23 = arith.constant dense<0.000000e+00> : vector<8x32xf32>
    %19 = tpu.matmul %15, %7, %cst_23 {dimension_numbers = #tpu.dot_dimension_numbers<[1], [0], [0], [1], [0, 0, 1, 1], [], []>, precision = #tpu.contract_precision<fp32>} : vector<8x16xf32>, vector<16x32xf32>, vector<8x32xf32> -> vector<8x32xf32>
    %20 = arith.addf %18, %19 : vector<8x32xf32>
    %cst_24 = arith.constant dense<0.000000e+00> : vector<8x32xf32>
    %21 = tpu.matmul %17, %11, %cst_24 {dimension_numbers = #tpu.dot_dimension_numbers<[1], [0], [0], [1], [0, 0, 1, 1], [], []>, precision = #tpu.contract_precision<fp32>} : vector<8x16xf32>, vector<16x32xf32>, vector<8x32xf32> -> vector<8x32xf32>
    %22 = arith.addf %20, %21 : vector<8x32xf32>
    %23 = vector.broadcast %12 : vector<1x32xf32> to vector<8x32xf32>
    %24 = arith.addf %22, %23 : vector<8x32xf32>
    %c0_25 = arith.constant 0 : index
    %c0_26 = arith.constant 0 : index
    %c0_27 = arith.constant 0 : index
    %25 = vector.load %arg5[%c0_25, %c0_26, %c0_27] : memref<1x8x32xf32, #tpu.memory_space<vmem>>, vector<1x8x32xf32>
    %26 = vector.shape_cast %25 : vector<1x8x32xf32> to vector<8x32xf32>
    %27 = vector.shape_cast %24 : vector<8x32xf32> to vector<1x8x32xf32>
    tpu.vector_store %arg5[%c0_25, %c0_26, %c0_27], %27 {strides = array<i32>} : memref<1x8x32xf32, #tpu.memory_space<vmem>>, vector<1x8x32xf32>,
    return
  }
  func.func @transform_0(%arg0: i32) -> (i32, i32, i32) {
    %c0_i32 = arith.constant 0 : i32
    %c0_i32_0 = arith.constant 0 : i32
    %c0_i32_1 = arith.constant 0 : i32
    return %arg0, %c0_i32, %c0_i32_0 : i32, i32, i32
  }
  func.func @transform_1(%arg0: i32) -> (i32, i32, i32) {
    %c0_i32 = arith.constant 0 : i32
    %c0_i32_0 = arith.constant 0 : i32
    %c0_i32_1 = arith.constant 0 : i32
    %c0_i32_2 = arith.constant 0 : i32
    return %c0_i32, %c0_i32_0, %c0_i32_1 : i32, i32, i32
  }
  func.func @transform_2(%arg0: i32) -> (i32, i32, i32) {
    %c0_i32 = arith.constant 0 : i32
    %c0_i32_0 = arith.constant 0 : i32
    %c0_i32_1 = arith.constant 0 : i32
    %c0_i32_2 = arith.constant 0 : i32
    return %c0_i32, %c0_i32_0, %c0_i32_1 : i32, i32, i32
  }
  func.func @transform_3(%arg0: i32) -> (i32, i32) {
    %c0_i32 = arith.constant 0 : i32
    %c0_i32_0 = arith.constant 0 : i32
    %c0_i32_1 = arith.constant 0 : i32
    return %c0_i32, %c0_i32_0 : i32, i32
  }
  func.func @transform_4(%arg0: i32) -> (i32, i32, i32) {
    %c0_i32 = arith.constant 0 : i32
    %c0_i32_0 = arith.constant 0 : i32
    %c0_i32_1 = arith.constant 0 : i32
    return %arg0, %c0_i32, %c0_i32_0 : i32, i32, i32
  }
}

</mosaic_0001>

<bundles_post_ra>
// kernel: tpu_custom_call.1
= control target key start
LH: loop header
LB: loop body
LE: loop exit
PB: predicated region body
PF: predicated region fallthrough
CT: control target
= control target key end

     0   :  { %9 = vsyncpa [#allocation3], 0  ;;  %s1855_s0 = inlined_call_operand.hbm [shape: f32[2,16,16], index: 0, kind: input, shape index: {}]   ;;  %s1856_s1 = inlined_call_operand.hbm [shape: f32[3,8,16], index: 1, kind: input, shape index: {}]   ;;  %s1857_s2 = inlined_call_operand.hbm [shape: f32[3,16,32], index: 2, kind: input, shape index: {}]   ;;  %s1858_s3 = inlined_call_operand.vmem [shape: f32[1,32], index: 3, kind: input, shape index: {}]   ;;  %s1859_s4 = inlined_call_operand.hbm [shape: f32[2,8,32], index: 4, kind: output, shape index: {}]  }
   0x1   :  { %11 = vsyncpa [#allocation3 + $0x1], 0 }
   0x2   :  { %12 = vsyncpa [#allocation6], 0 }
   0x3   :  { %13 = vsyncpa [#allocation4], 0 }
   0x4   :  { %15 = vsyncpa [#allocation4 + $0x1], 0  ;;  %s1631_s15 = smov 0   ;;  %s1633_s16 = smov 0  }
   0x5   :  { %s1635_s17 = smov 0   ;;  %s1637_s18 = smov 0  }
   0x6 LB: > { %s1652_s19 = sadd.s32 4294967295, %s1600_s18   ;;  %s1352_s20 = sadd.s32 4294967294, %s1600_s18   ;;  %s1600_s18 = sphi %s1637_s18, %s1869_s18   ;;  %s1596_s17 = sphi %s1635_s17, %s1868_s17   ;;  %s1592_s16 = sphi %s1633_s16, %s1867_s16   ;;  %s1588_s15 = sphi %s1631_s15, %s1866_s15  }
   0x7   : > { %p41_p0 = scmp.ne.s32.totalorder %s1592_s16, %s1588_s15  ;;  %p42_p1 = scmp.eq.s32.totalorder %s1652_s19, 0 }
   0x8   : > { %p128_p2 = scmp.eq.s32.totalorder %s1652_s19, 1  ;;  %p134_p3 = scmp.eq.s32.totalorder %s1352_s20, 1 }
   0x9   : > { %p1661_p4 = por %p42_p1, %p41_p0  ;;  %p1353_p5 = scmp.ge.s32.totalorder %s1600_s18, 1 }
   0xa   : > { %p1666_p6 = por %p134_p3, %p41_p0  ;;  %p141_p7 = scmp.lt.s32.totalorder %s1600_s18, 3 }
   0xb   : > { %s152_s25 = sshll.u32 %s1856_s1, 4  ;;  %s1602_s27 = smov [#allocation5]   ;;  %s153_s25 = int_to_ptr.hbm [resolvable:$true] %s152_s25 }
   0xc   : > { %p1674_p8 = pnand %p1353_p5, %p141_p7  ;;  %s154_s28 = sshll.u32 %s1602_s27, 4  ;;  %s155_s28 = int_to_ptr.vmem [resolvable:$true] %s154_s28 }
   0xd   : > { %s166_s5 = sshll.u32 %s1857_s2, 4  ;;  %s1603_s6 = smov 128   ;;  %s167_s5 = int_to_ptr.hbm [resolvable:$true] %s166_s5 }
   0xe   : > { %p1382_p9 = pneg %p1674_p8  ;;  %s1604_s7 = smov 8  }
   0xf   : > { %s1605_s8 = smov [#allocation7]   ;;  %s1693_s10 = sadd.s32 1, %s1600_s18  }
  0x10   : > { %p1383_p10 = pnand %p1382_p9, %p42_p1  ;;  %s168_s9 = sshll.u32 %s1605_s8, 4  ;;  %s169_s9 = int_to_ptr.vmem [resolvable:$true] %s168_s9 }
  0x11   : > { %s28_s11 = sadd.s32 1, %s1596_s17  ;;  %s25_s12 = ssub.s32 %s1600_s18, %s1693_s10 }
  0x12   : > { %1385 = dma.hbm_to_vmem [thread:$0]  (!%p1383_p10), %s153_s25, 384, %s155_s28, [#allocation6], %s1603_s6, %s1603_s6, %s1604_s7  }
  0x13   : > { %1388 = dma.hbm_to_vmem [thread:$0]  (!%p1383_p10), %s167_s5, 768, %s169_s9, [#allocation6], %s1603_s6, %s1603_s6, %s1604_s7  }
  0x14   : > { %p35_p12 = scmp.ne.s32.totalorder %s1596_s17, %s1592_s16  ;;  %p26_p13 = scmp.eq.s32.totalorder %s25_s12, 0 }
  0x15   : > { %p36_p0 = scmp.eq.s32.totalorder %s1600_s18, 0  ;;  %p1399_p5 = scmp.lt.s32.totalorder %s1600_s18, 2 }
  0x16   : > { %p1703_p3 = por %p128_p2, %p35_p12  ;;  %s185_s20 = sand.u32 1, %s1596_s17  }
  0x17   : > { %s1709_s14 = scalar_select %p26_p13, %s1596_s17, %s28_s11  }
  0x18   : > { %p37_p7 = por %p36_p0, %p35_p12  ;;  %s1357_s23 = sshll.u32 %s185_s20, 4 }
  0x19   : > { %s1369_s24 = sshll.u32 %s1600_s18, 4  ;;  %s189_s29 = scalar_lea.vmem [#allocation2], %s1357_s23 }
  0x1a   : > { %s194_s28 = scalar_lea.hbm %s1855_s0, %s1369_s24  ;;  %s197_s30 = sshll.u32 %s189_s29, 4  ;;  %s198_s30 = int_to_ptr.vmem [resolvable:$true] %s197_s30 }
  0x1b   : > { %s195_s5 = sshll.u32 %s194_s28, 4  ;;  %p1716_p2 = pnand %p1399_p5, %p37_p7  ;;  %s196_s5 = int_to_ptr.hbm [resolvable:$true] %s195_s5 }
  0x1c   : > { %s186_s9 = scalar_lea.sflag [#allocation3], %s185_s20  ;;  %s1500_s11 = sshra.s32 %s196_s5, 4  ;;  %s1501_s11 = int_to_ptr.hbm [resolvable:$true] %s1500_s11 }
  0x1d   : > { %s1502_s12 = scalar_lea.hbm %s1501_s11, 16  ;;  %p1504_p10 = pneg %p1716_p2 }
  0x1e   : > { %p1503_p9 = scmp.ne.s32.totalorder %s1501_s11, %s1502_s12  ;;  %s1507_s25 = scalar_lea.hbm %s1855_s0, 32 }
  0x1f   : > { %p1508_p0 = scmp.lt.s32.totalorder %s1501_s11, %s1855_s0  ;;  %p1509_p5 = scmp.lt.s32.totalorder %s1507_s25, %s1502_s12 }
  0x20   : > { %p1505_p12 = pnand %p1504_p10, %p1503_p9 }
  0x21   : > { %p1510_p7 = por %p1509_p5, %p1508_p0 }
  0x22   : > { %p1506_p13 = pneg %p1505_p12 }
  0x24   : > { %p1511_p11 = pnand %p1510_p7, %p1506_p13 }
  0x26   : > { %1514 = shalt.err (!%p1511_p11)
}
  0x27   : > { %1392 = dma.hbm_to_vmem [thread:$0]  (!%p1716_p2), %s196_s5, 256, %s198_s30, %s186_s9, %s1603_s6, %s1603_s6, %s1604_s7  }
  0x28   : > { %209 = sbr.rel (%p1674_p8) target bundleno = 385 (0x181), region = 36  ;;  %s1736_s20 = sand.u32 (!%p1674_p8), 1, %s1592_s16  }
  0x29   : > { %s1361_s29 = sshll.u32 (!%p1674_p8), %s1736_s20, 4  ;;  %s212_s11 = scalar_lea.sflag (!%p1674_p8), [#allocation3], %s1736_s20 }
  0x2a   : > { %s215_s12 = scalar_lea.vmem (!%p1674_p8), [#allocation2], %s1361_s29 }
  0x2d   : > { %1575 = dma.done.wait (%p1661_p4), %s212_s11, 256  }
  0x2e   : > { %1577 = vsyncadd (%p1661_p4), %s212_s11, 4294967040 }
  0x2f   : > { %1579 = dma.done.wait (%p42_p1), [#allocation6], 1152  }
  0x30   : > { %1581 = vsyncadd (%p42_p1), [#allocation6], 4294966144  ;;  %vm267_vm0 = vcmask 130048   ;;  %v266_v0 = vld [vmem:[%s215_s12 + $0x8] sm:$0xff]  ;;  %v265_v1 = vld [vmem:[%s215_s12] sm:$0xff]  ;;  %s1364_s21 = sshll.u32 %s1736_s20, 3 }
  0x31   : > { %v251_v2 = vld [vmem:[#allocation5] sm:$0xff]  ;;  %v1748_v3 = vand.u32 4294901760, %v266_v0  ;;  %v1750_v4 = vand.u32 4294901760, %v265_v1  ;;  %v253_v6 = vld [vmem:[#allocation5 + $0x8] sm:$0xff]  ;;  %v255_v25 = vld [vmem:[#allocation5 + $0x10] sm:$0xff]  ;;  %s1366_s26 = sshll.u32 %s1652_s19, 3 }
  0x32   : > { %v269_v5 = vsel %vm267_vm0, %v251_v2, 0  ;;  %v431_v8 = vsel %vm267_vm0, %v253_v6, 0  ;;  %v593_v27 = vsel %vm267_vm0, %v255_v25, 0  ;;  %v257_v33 = vld [vmem:[#allocation7 + $0x8] sm:$0xff]  ;;  %v256_v35 = vld [vmem:[#allocation7] sm:$0xff]  ;;  %v260_v45 = vld [vmem:[#allocation7 + $0x18] sm:$0xff]  ;;  %s1258_s30 = scalar_lea.hbm %s1859_s4, %s1366_s26 }
  0x33   : > { %v289_v7 = vand.u32 4294901760, %v269_v5  ;;  %v313_v9 = vsub.f32 %v266_v0, %v1748_v3  ;;  %370 = vmatpush.msra.mxu3 %v1748_v3  ;;  %286 = vmatpush.msra.mxu0 %v1748_v3  ;;  %v319_v10 = vsub.f32 %v265_v1, %v1750_v4  ;;  %v451_v11 = vand.u32 4294901760, %v431_v8  ;;  %v259_v47 = vld [vmem:[#allocation7 + $0x10] sm:$0xff]  ;;  %v263_v60 = vld [vmem:[#allocation7 + $0x28] sm:$0xff]  ;;  %v262_v63 = vld [vmem:[#allocation7 + $0x20] sm:$0xff]  ;;  %s250_s9 = scalar_lea.vmem [#allocation8], %s1364_s21 }
  0x34   : > { %v613_v28 = vand.u32 4294901760, %v593_v27  ;;  %v771_v34 = vand.u32 4294901760, %v257_v33  ;;  %v773_v37 = vand.u32 4294901760, %v256_v35  ;;  %v933_v46 = vand.u32 4294901760, %v260_v45  ;;  %s1260_s24 = sshll.u32 %s250_s9, 4  ;;  %s1262_s19 = sshll.u32 %s1258_s30, 4  ;;  %s1261_s24 = int_to_ptr.vmem [resolvable:$true] %s1260_s24  ;;  %s1263_s19 = int_to_ptr.hbm [resolvable:$true] %s1262_s19 }
  0x35   : > { %v290_v12 = vsub.f32 %v269_v5, %v289_v7  ;;  %345 = vmatpush.msra.mxu2 %v313_v9  ;;  %372 = vmatpush.msra.mxu3 %v1750_v4  ;;  %v314_v13 = vand.u32 4294901760, %v313_v9  ;;  %v320_v14 = vand.u32 4294901760, %v319_v10  ;;  %v452_v15 = vsub.f32 %v431_v8, %v451_v11  ;;  %s1248_s23 = scalar_lea.sflag [#allocation4], %s1736_s20  ;;  %s1544_s25 = sshra.s32 %s1263_s19, 4  ;;  %s1545_s25 = int_to_ptr.hbm [resolvable:$true] %s1544_s25 }
  0x36   : > { %288 = vmatpush.msra.mxu0 %v1750_v4  ;;  %v614_v29 = vsub.f32 %v593_v27, %v613_v28  ;;  %v799_v36 = vsub.f32 %v257_v33, %v771_v34  ;;  %v805_v39 = vsub.f32 %v256_v35, %v773_v37  ;;  %v1775_v48 = vsub.f32 %v260_v45, %v933_v46  ;;  %s1546_s27 = scalar_lea.hbm %s1545_s25, 8  ;;  %s1550_s11 = scalar_lea.hbm %s1859_s4, 16 }
  0x37   : > { %v291_v16 = vand.u32 4294901760, %v290_v12  ;;  %348 = vmatpush.msra.mxu2 %v319_v10  ;;  %v315_v17 = vsub.f32 %v313_v9, %v314_v13  ;;  %v321_v18 = vsub.f32 %v319_v10, %v320_v14  ;;  %v453_v19 = vand.u32 4294901760, %v452_v15  ;;  %p1547_p1 = scmp.ne.s32.totalorder %s1545_s25, %s1546_s27  ;;  %p1551_p11 = scmp.lt.s32.totalorder %s1545_s25, %s1859_s4 }
  0x38   : > { %397 = vmatpush.msrb.mxu0 %v314_v13  ;;  %351 = vmatmul.f32.vlgmr.msra.gmra.mxu2 %v290_v12  ;;  %v615_v30 = vand.u32 4294901760, %v614_v29  ;;  %v800_v38 = vand.u32 4294901760, %v799_v36  ;;  %v806_v41 = vand.u32 4294901760, %v805_v39  ;;  %v935_v49 = vand.u32 4294901760, %v259_v47  ;;  %p1552_p2 = scmp.lt.s32.totalorder %s1550_s11, %s1546_s27 }
  0x39   : > { %376 = vmatmul.f32.vlgmr.msra.gmra.mxu3 %v291_v16  ;;  %v292_v20 = vsub.f32 %v290_v12, %v291_v16  ;;  %448 = vmatpush.msrb.mxu2 %v1748_v3  ;;  %v316_v21 = vand.u32 4294901760, %v315_v17  ;;  %v322_v22 = vand.u32 4294901760, %v321_v18  ;;  %v454_v23 = vsub.f32 %v452_v15, %v453_v19  ;;  %p1548_p4 = pnand %p1547_p1, %p1703_p3 }
  0x3a   : > { %401 = vmatpush.msrb.mxu0 %v320_v14  ;;  %v616_v31 = vsub.f32 %v614_v29, %v615_v30  ;;  %v801_v40 = vsub.f32 %v799_v36, %v800_v38  ;;  %v807_v43 = vsub.f32 %v805_v39, %v806_v41  ;;  %v962_v50 = vand.u32 4294901760, %v1775_v48  ;;  %p1553_p9 = por %p1552_p2, %p1551_p11 }
  0x3b   : > { %v293_v24 = vand.u32 4294901760, %v292_v20  ;;  %317 = vmatpush.msra.mxu1 %v316_v21  ;;  %479 = vmatpush.msrb.mxu3 %v316_v21  ;;  %v455_v26 = vand.u32 4294901760, %v454_v23  ;;  %v1778_v51 = vsub.f32 %v259_v47, %v935_v49  ;;  %v1783_v1 = vand.u32 4294901760, %v263_v60  ;;  %p1549_p8 = pneg %p1548_p4 }
  0x3c   : > { %450 = vmatpush.msrb.mxu2 %v1750_v4  ;;  %v617_v32 = vand.u32 4294901760, %v616_v31  ;;  %v802_v42 = vand.u32 4294901760, %v801_v40  ;;  %v808_v44 = vand.u32 4294901760, %v807_v43  ;;  %v963_v52 = vsub.f32 %v1775_v48, %v962_v50 }
  0x3d   : > { %294 = vmatmul.f32.vlgmr.msra.gmra.mxu0 %v293_v24  ;;  %323 = vmatpush.msra.mxu1 %v322_v22  ;;  %v968_v53 = vand.u32 4294901760, %v1778_v51  ;;  %v1788_v6 = vsub.f32 %v263_v60, %v1783_v1  ;;  %vm1245_vm1 = vcmask 261120   ;;  %p1554_p10 = pnand %p1553_p9, %p1549_p8 }
  0x3e   : > { %485 = vmatpush.msrb.mxu3 %v322_v22  ;;  %325 = vmatmul.f32.vlgmr.msra.gmra.mxu1 %v289_v7  ;;  %v964_v54 = vand.u32 4294901760, %v963_v52 }
  0x3f   : > { %559 = vmatpush.msra.mxu2 %v314_v13  ;;  %422 = vmatpush.msrb.mxu1 %v1748_v3  ;;  %v969_v55 = vsub.f32 %v1778_v51, %v968_v53 }
  0x40   : > { %507 = vmatpush.msra.mxu0 %v313_v9  ;;  %456 = vmatmul.f32.vlgmr.msrb.gmra.mxu2 %v455_v26 }
  0x41   : > { %487 = vmatmul.f32.vlgmr.msrb.gmra.mxu3 %v451_v11  ;;  %424 = vmatpush.msrb.mxu1 %v1750_v4  ;;  %v970_v56 = vand.u32 4294901760, %v969_v55 }
  0x42   : > { %584 = vmatpush.msra.mxu3 %v1748_v3  ;;  %563 = vmatpush.msra.mxu2 %v320_v14 }
  0x43   : > { %532 = vmatpush.msra.mxu1 %v1748_v3  ;;  %510 = vmatpush.msra.mxu0 %v319_v10 }
  0x44   : > { %586 = vmatpush.msra.mxu3 %v1750_v4  ;;  %669 = vmatpush.msrb.mxu2 %v313_v9 }
  0x45   : > { %403 = vmatmul.f32.vlgmr.msrb.gmra.mxu0 %v289_v7  ;;  %534 = vmatpush.msra.mxu1 %v1750_v4 }
  0x46   : > { %610 = vmatpush.msrb.mxu0 %v1748_v3  ;;  %426 = vmatmul.f32.vlgmr.msrb.gmra.mxu1 %v289_v7 }
  0x47   : > { %694 = vmatpush.msrb.mxu3 %v1748_v3  ;;  %641 = vmatpush.msrb.mxu1 %v316_v21 }
  0x48   : > { %672 = vmatpush.msrb.mxu2 %v319_v10  ;;  %612 = vmatpush.msrb.mxu0 %v1750_v4 }
  0x49   : > { %565 = vmatmul.f32.vlgmr.msra.gmra.mxu2 %v451_v11  ;;  %588 = vmatmul.f32.vlgmr.msra.gmra.mxu3 %v451_v11 }
  0x4a   : > { %696 = vmatpush.msrb.mxu3 %v1750_v4  ;;  %647 = vmatpush.msrb.mxu1 %v322_v22 }
  0x4b   : > { %772 = vmatpush.msra.mxu2 %v771_v34 }
  0x4c   : > { %803 = vmatpush.msra.mxu3 %v802_v42 }
  0x4d   : > { %513 = vmatmul.f32.vlgmr.msra.gmra.mxu0 %v452_v15  ;;  %774 = vmatpush.msra.mxu2 %v773_v37 }
  0x4e   : > { %721 = vmatpush.msra.mxu0 %v314_v13  ;;  %538 = vmatmul.f32.vlgmr.msra.gmra.mxu1 %v453_v19  ;;  %v1124_v13 = vand.u32 4294901760, %v1788_v6 }
  0x4f   : > { %746 = vmatpush.msra.mxu1 %v1748_v3  ;;  %809 = vmatpush.msra.mxu3 %v808_v44  ;;  %v1785_v3 = vand.u32 4294901760, %v262_v63 }
  0x50   : > { %725 = vmatpush.msra.mxu0 %v320_v14  ;;  %v1125_v20 = vsub.f32 %v1788_v6, %v1124_v13 }
  0x51   : > { %675 = vmatmul.f32.vlgmr.msrb.gmra.mxu2 %v614_v29  ;;  %700 = vmatmul.f32.vlgmr.msrb.gmra.mxu3 %v615_v30  ;;  %v1791_v11 = vsub.f32 %v262_v63, %v1785_v3 }
  0x52   : > { %748 = vmatpush.msra.mxu1 %v1750_v4  ;;  %883 = vmatpush.msrb.mxu2 %v800_v38  ;;  %v1126_v29 = vand.u32 4294901760, %v1125_v20 }
  0x53   : > { %908 = vmatpush.msrb.mxu3 %v771_v34  ;;  %v1130_v16 = vand.u32 4294901760, %v1791_v11 }
  0x54   : > { %887 = vmatpush.msrb.mxu2 %v806_v41 }
  0x55   : > { %618 = vmatmul.f32.vlgmr.msrb.gmra.mxu0 %v617_v32  ;;  %910 = vmatpush.msrb.mxu3 %v773_v37  ;;  %v1131_v26 = vsub.f32 %v1791_v11, %v1130_v16 }
  0x56   : > { %649 = vmatmul.f32.vlgmr.msrb.gmra.mxu1 %v613_v28  ;;  %831 = vmatpush.msrb.mxu0 %v799_v36 }
  0x57   : > { %856 = vmatpush.msrb.mxu1 %v771_v34  ;;  %v1132_v32 = vand.u32 4294901760, %v1131_v26  ;;  %v1439_v26 = vld [vmem:[%s1858_s3] ss:$0 sm:$0xff] }
  0x58   : > { %834 = vmatpush.msrb.mxu0 %v805_v39 }
  0x59   : > { %858 = vmatpush.msrb.mxu1 %v773_v37 }
  0x5d   : > { %727 = vmatmul.f32.vlgmr.msra.gmra.mxu0 %v613_v28 }
  0x5e   : > { %750 = vmatmul.f32.vlgmr.msra.gmra.mxu1 %v613_v28  ;;  %934 = vmatpush.msra.mxu0 %v933_v46 }
  0x5f   : > { %965 = vmatpush.msra.mxu1 %v964_v54 }
  0x60   : > { %936 = vmatpush.msra.mxu0 %v935_v49 }
  0x61   : > { %971 = vmatpush.msra.mxu1 %v970_v56 }
  0xba   : > { %v295_v57 = vpop.f32.mrf.mxu0 }
  0xbb   : > { %v326_v58 = vpop.f32.mrf.mxu1  ;;  %v352_v59 = vpop.f32.mrf.mxu2 }
  0xbc   : > { %v327_v61 = vadd.f32 %v326_v58, %v295_v57  ;;  %v377_v62 = vpop.f32.mrf.mxu3 }
  0xbe   : > { %v353_v0 = vadd.f32 %v352_v59, %v327_v61 }
  0xc0   : > { %v378_v2 = vadd.f32 %v377_v62, %v353_v0 }
  0xc2   : > { %v404_v4 = vpop.f32.mrf.mxu0 }
  0xc3   : > { %v405_v5 = vadd.f32 %v404_v4, %v378_v2  ;;  %v427_v7 = vpop.f32.mrf.mxu1  ;;  %v457_v8 = vpop.f32.mrf.mxu2 }
  0xc4   : > { %v488_v10 = vpop.f32.mrf.mxu3 }
  0xc5   : > { %v428_v9 = vadd.f32 %v427_v7, %v405_v5  ;;  %v489_v15 = vadd.f32 %v488_v10, %v457_v8 }
  0xc7   : > { %v755_v12 = vsel %vm267_vm0, %v428_v9, 0 }
  0xc8   : > { %v775_v14 = vand.u32 4294901760, %v755_v12 }
  0xca   : > { %v776_v17 = vsub.f32 %v755_v12, %v775_v14  ;;  %v514_v18 = vpop.f32.mrf.mxu0  ;;  %811 = vmatmul.f32.vlgmr.msra.gmra.mxu3 %v775_v14 }
  0xcb   : > { %v515_v19 = vadd.f32 %v514_v18, %v489_v15  ;;  %1018 = vmatpush.msra.mxu3 %v933_v46  ;;  %v539_v21 = vpop.f32.mrf.mxu1 }
  0xcc   : > { %837 = vmatmul.f32.vlgmr.msrb.gmra.mxu0 %v776_v17  ;;  %v566_v22 = vpop.f32.mrf.mxu2  ;;  %v777_v23 = vand.u32 4294901760, %v776_v17  ;;  %v589_v25 = vpop.f32.mrf.mxu3 }
  0xcd   : > { %v540_v24 = vadd.f32 %v539_v21, %v515_v19  ;;  %1020 = vmatpush.msra.mxu3 %v935_v49  ;;  %1045 = vmatpush.msrb.mxu0 %v962_v50 }
  0xce   : > { %862 = vmatmul.f32.vlgmr.msrb.gmra.mxu1 %v777_v23  ;;  %v778_v27 = vsub.f32 %v776_v17, %v777_v23 }
  0xcf   : > { %v567_v28 = vadd.f32 %v566_v22, %v540_v24  ;;  %1070 = vmatpush.msrb.mxu1 %v933_v46  ;;  %1049 = vmatpush.msrb.mxu0 %v968_v53 }
  0xd0   : > { %v779_v30 = vand.u32 4294901760, %v778_v27 }
  0xd1   : > { %v590_v31 = vadd.f32 %v589_v25, %v567_v28  ;;  %1072 = vmatpush.msrb.mxu1 %v935_v49 }
  0xd2   : > { %v619_v33 = vpop.f32.mrf.mxu0  ;;  %780 = vmatmul.f32.vlgmr.msra.gmra.mxu2 %v779_v30  ;;  %912 = vmatmul.f32.vlgmr.msrb.gmra.mxu3 %v775_v14 }
  0xd3   : > { %v917_v34 = vsel %vm267_vm0, %v590_v31, 0  ;;  %993 = vmatpush.msra.mxu2 %v1775_v48  ;;  %1127 = vmatpush.msrb.mxu3 %v1126_v29  ;;  %v650_v36 = vpop.f32.mrf.mxu1 }
  0xd4   : > { %v937_v35 = vand.u32 4294901760, %v917_v34  ;;  %v676_v37 = vpop.f32.mrf.mxu2  ;;  %v651_v38 = vadd.f32 %v650_v36, %v619_v33  ;;  %v701_v40 = vpop.f32.mrf.mxu3 }
  0xd5   : > { %996 = vmatpush.msra.mxu2 %v1778_v51  ;;  %1133 = vmatpush.msrb.mxu3 %v1132_v32 }
  0xd6   : > { %v938_v39 = vsub.f32 %v917_v34, %v937_v35  ;;  %973 = vmatmul.f32.vlgmr.msra.gmra.mxu1 %v937_v35  ;;  %v677_v41 = vadd.f32 %v676_v37, %v651_v38 }
  0xd7   : > { %1180 = vmatpush.msra.mxu1 %v1783_v1 }
  0xd8   : > { %v939_v42 = vand.u32 4294901760, %v938_v39  ;;  %v702_v43 = vadd.f32 %v701_v40, %v677_v41 }
  0xd9   : > { %1182 = vmatpush.msra.mxu1 %v1785_v3 }
  0xda   : > { %v728_v44 = vpop.f32.mrf.mxu0  ;;  %889 = vmatmul.f32.vlgmr.msrb.gmra.mxu2 %v775_v14  ;;  %1024 = vmatmul.f32.vlgmr.msra.gmra.mxu3 %v939_v42  ;;  %v940_v45 = vsub.f32 %v938_v39, %v939_v42 }
  0xdb   : > { %v729_v46 = vadd.f32 %v728_v44, %v702_v43  ;;  %1096 = vmatpush.msrb.mxu2 %v1783_v1  ;;  %1232 = vmatpush.msra.mxu3 %v1783_v1  ;;  %v751_v47 = vpop.f32.mrf.mxu1 }
  0xdc   : > { %v941_v48 = vand.u32 4294901760, %v940_v45 }
  0xdd   : > { %v752_v49 = vadd.f32 %v751_v47, %v729_v46  ;;  %1098 = vmatpush.msrb.mxu2 %v1785_v3  ;;  %1234 = vmatpush.msra.mxu3 %v1785_v3 }
  0xde   : > { %942 = vmatmul.f32.vlgmr.msra.gmra.mxu0 %v941_v48  ;;  %1074 = vmatmul.f32.vlgmr.msrb.gmra.mxu1 %v937_v35 }
  0xdf   : > { %v1079_v50 = vsel %vm267_vm0, %v752_v49, 0  ;;  %1155 = vmatpush.msra.mxu0 %v1788_v6 }
  0xe0   : > { %v1099_v51 = vand.u32 4294901760, %v1079_v50 }
  0xe1   : > { %1158 = vmatpush.msra.mxu0 %v1791_v11 }
  0xe2   : > { %v1100_v52 = vsub.f32 %v1079_v50, %v1099_v51  ;;  %999 = vmatmul.f32.vlgmr.msra.gmra.mxu2 %v938_v39  ;;  %1135 = vmatmul.f32.vlgmr.msrb.gmra.mxu3 %v1099_v51 }
  0xe3   : > { %1207 = vmatpush.msra.mxu2 %v1124_v13 }
  0xe4   : > { %v1101_v53 = vand.u32 4294901760, %v1100_v52 }
  0xe5   : > { %1211 = vmatpush.msra.mxu2 %v1130_v16 }
  0xe6   : > { %1051 = vmatmul.f32.vlgmr.msrb.gmra.mxu0 %v937_v35  ;;  %1186 = vmatmul.f32.vlgmr.msra.gmra.mxu1 %v1101_v53  ;;  %v1102_v54 = vsub.f32 %v1100_v52, %v1101_v53 }
  0xe8   : > { %v1103_v55 = vand.u32 4294901760, %v1102_v54 }
  0xea   : > { %1104 = vmatmul.f32.vlgmr.msrb.gmra.mxu2 %v1103_v55  ;;  %1236 = vmatmul.f32.vlgmr.msra.gmra.mxu3 %v1099_v51 }
  0xee   : > { %1161 = vmatmul.f32.vlgmr.msra.gmra.mxu0 %v1100_v52 }
  0xf2   : > { %1213 = vmatmul.f32.vlgmr.msra.gmra.mxu2 %v1099_v51 }
 0x149   : > { %v838_v57 = vpop.f32.mrf.mxu0 }
 0x14b   : > { %v863_v58 = vpop.f32.mrf.mxu1 }
 0x14d   : > { %v812_v56 = vpop.f32.mrf.mxu3 }
 0x153   : > { %v974_v3 = vpop.f32.mrf.mxu1 }
 0x155   : > { %v781_v59 = vpop.f32.mrf.mxu2  ;;  %v913_v62 = vpop.f32.mrf.mxu3 }
 0x156   : > { %v813_v60 = vadd.f32 %v812_v56, %v781_v59 }
 0x158   : > { %v839_v61 = vadd.f32 %v838_v57, %v813_v60 }
 0x15a   : > { %v864_v0 = vadd.f32 %v863_v58, %v839_v61 }
 0x15b   : > { %v943_v63 = vpop.f32.mrf.mxu0  ;;  %v1075_v10 = vpop.f32.mrf.mxu1 }
 0x15d   : > { %v890_v1 = vpop.f32.mrf.mxu2  ;;  %v1025_v5 = vpop.f32.mrf.mxu3 }
 0x15e   : > { %v891_v2 = vadd.f32 %v890_v1, %v864_v0 }
 0x160   : > { %v914_v4 = vadd.f32 %v913_v62, %v891_v2 }
 0x162   : > { %v944_v6 = vadd.f32 %v943_v63, %v914_v4 }
 0x163   : > { %v1052_v7 = vpop.f32.mrf.mxu0  ;;  %v1187_v18 = vpop.f32.mrf.mxu1 }
 0x164   : > { %v975_v9 = vadd.f32 %v974_v3, %v944_v6 }
 0x165   : > { %v1000_v8 = vpop.f32.mrf.mxu2  ;;  %v1136_v12 = vpop.f32.mrf.mxu3 }
 0x166   : > { %v1001_v11 = vadd.f32 %v1000_v8, %v975_v9 }
 0x168   : > { %v1026_v16 = vadd.f32 %v1025_v5, %v1001_v11 }
 0x16a   : > { %v1053_v19 = vadd.f32 %v1052_v7, %v1026_v16 }
 0x16b   : > { %v1162_v15 = vpop.f32.mrf.mxu0 }
 0x16c   : > { %v1076_v24 = vadd.f32 %v1075_v10, %v1053_v19 }
 0x16d   : > { %v1105_v13 = vpop.f32.mrf.mxu2  ;;  %v1237_v23 = vpop.f32.mrf.mxu3 }
 0x16e   : > { %v1137_v14 = vadd.f32 %v1136_v12, %v1105_v13 }
 0x170   : > { %v1163_v17 = vadd.f32 %v1162_v15, %v1137_v14 }
 0x172   : > { %v1188_v20 = vadd.f32 %v1187_v18, %v1163_v17 }
 0x175   : > { %v1214_v21 = vpop.f32.mrf.mxu2 }
 0x176   : > { %v1215_v22 = vadd.f32 %v1214_v21, %v1188_v20 }
 0x178   : > { %v1238_v25 = vadd.f32 %v1237_v23, %v1215_v22 }
 0x17a   : > { %v1240_v27 = vadd.f32 %v1238_v25, %v1076_v24 }
 0x17c   : > { %v1244_v28 = vadd.f32 %v1439_v26, %v1240_v27 }
 0x17e   : > { %1246 = vst.msk [vmem:[%s250_s9] sm:$0xff] %vm1245_vm1, %v1244_v28 }
 0x17f   : > { %1557 = shalt.err (!%p1554_p10)
}
 0x180   : > { %1380 = dma.vmem_to_hbm [thread:$0]  (%p1703_p3), %s1261_s24, 128, %s1263_s19, %s1248_s23  }
 0x181 PF: > { %s1274_s20 = sand.u32 1, %s1588_s15   ;;  %p1865_p12 = scmp.ge.s32.totalorder %s1600_s18, 2 }
 0x182   : > { %s1275_s26 = scalar_lea.sflag [#allocation4], %s1274_s20 }
 0x183   : > { %p1394_p13 = pnand %p1865_p12, %p1666_p6 }
 0x185   : > { %p1395_p0 = pneg %p1394_p13 }
 0x187   : > { %1583 = dma.done.wait (%p1395_p0), %s1275_s26, 128  }
 0x188   : > { %1585 = vsyncadd (%p1395_p0), %s1275_s26, 4294967168  ;;  %p18_p5 = scmp.ge.s32.totalorder %s1693_s10, 4   ;;  %s1866_s15 = smov %s1592_s16 }
 0x189   : > { %s1867_s16 = smov %s1596_s17  ;;  %s1868_s17 = smov %s1709_s14 }
 0x18a   : > { %s1869_s18 = smov %s1693_s10  ;;  %20 = sbr.rel (!%p18_p5) target bundleno = 6 (0x6), region = 93 }
 0x18f   :  { %1281 = vsyncpa [#allocation3], 1 }
 0x190   :  { %1283 = vsyncpa [#allocation3 + $0x1], 1 }
 0x191   :  { %1284 = vsyncpa [#allocation6], 1 }
 0x192   :  { %1285 = vsyncpa [#allocation4], 1 }
 0x193   :  { %1287 = vsyncpa [#allocation4 + $0x1], 1 }

</bundles_post_ra>
